<compile_context>
chip_gen: v7x
topology: tpu7x:2x2x1
jax: 0.10.0
libtpu: 0.0.40
codegen_flags: <defaults>
</compile_context>

<pallas_src>
import functools

import jax
import jax.numpy as jnp
from jax import lax
from jax.experimental import pallas as pl
from jax.experimental.pallas import tpu as pltpu


_MAX_TILE_T = 4096      # rows per grid step; ~5 MiB VMEM worst case (see header)
_LANES = 128
_BF16_SUBLANES = 16


def _round_up(x, m):
    return (x + m - 1) // m * m


def _cdiv(a, b):
    return -(-a // b)


def _fused_matmul_kernel(p_ref, w_ref, o_ref):
    """One (tile_t, CKpad) @ (CKpad, Apad) MXU matmul per grid step.

    p_ref : (tile_t, CKpad) bf16  im2col patches (k-major, c-minor columns)
    w_ref : (CKpad, Apad)   bf16  fused conv*dense weight (resident)
    o_ref : (tile_t, Apad)  f32   lane-dense output tile
    """
    o_ref[...] = jnp.dot(
        p_ref[...], w_ref[...],
        preferred_element_type=jnp.float32).astype(o_ref.dtype)


def fuse_location_weights(conv_weight, dense_weight_t):
    """Fold conv + dense weights into one padded bf16 matrix (precompute this
    once for inference; the fusion sum over F is done in f32 before casting).

    conv_weight   : (F, 2, K) f32   torch Conv1d weight layout
    dense_weight_t: (F, A)    f32   torch Linear weight, transposed
    returns       : (round_up(2K,16), round_up(A,128)) bf16 with
                    row index = k*2 + c  (matches the patch concat layout)
    """
    F, C, K = conv_weight.shape
    assert C == 2
    A = dense_weight_t.shape[1]
    ck_pad = _round_up(2 * K, _BF16_SUBLANES)
    a_pad = _round_up(A, _LANES)
    wf = jnp.einsum("fck,fa->kca",
                    conv_weight.astype(jnp.float32),
                    dense_weight_t.astype(jnp.float32))      # (K, 2, A) in f32
    wf = wf.reshape(2 * K, A)                                 # row = k*2 + c
    wf = jnp.pad(wf, ((0, ck_pad - 2 * K), (0, a_pad - A)))
    return wf.astype(jnp.bfloat16)


@functools.partial(jax.jit, static_argnames=("kernel_size", "attention_dim"))
def location_layer_apply(attention_weights_cat, wf_fused, *, kernel_size,
                         attention_dim):
    """attention_weights_cat: (B, 2, T) f32
       wf_fused             : output of fuse_location_weights (bf16, padded)
       returns              : (B, T, attention_dim) f32
    """
    B, C, T = attention_weights_cat.shape
    assert C == 2
    K = kernel_size
    A = attention_dim
    assert K % 2 == 1, "kernel_size must be odd for 'same' padding semantics"
    pad = (K - 1) // 2
    ck_pad = _round_up(2 * K, _BF16_SUBLANES)
    a_pad = _round_up(A, _LANES)
    assert wf_fused.shape == (ck_pad, a_pad)
    assert wf_fused.dtype == jnp.bfloat16

    # ---- T tiling: biggest tile inside the all-generation VMEM budget,
    # minimal padding, and an even number of parallel grid steps for the
    # v7x 2-TensorCore megacore when the batch alone cannot provide it.
    if T <= _MAX_TILE_T:
        nt = 1
    else:
        nt = _cdiv(T, _MAX_TILE_T)
        if B % 2 == 1 and nt % 2 == 1:
            nt += 1
    tile_t = _round_up(_cdiv(T, nt), _BF16_SUBLANES)
    t_pad = nt * tile_t

    # ---- im2col patches: K static slices + one concat (no gather, no
    # transpose-copy of the expanded tensor; only the tiny raw input is
    # transposed).  Conv 'same' zero padding, T padding and the contraction
    # padding to ck_pad are all folded into the same cheap ops.
    x = attention_weights_cat.astype(jnp.bfloat16)
    x = jnp.pad(x, ((0, 0), (0, 0), (pad, pad + t_pad - T)))   # (B, 2, t_pad+2p)
    x_t = x.transpose(0, 2, 1)                                 # (B, t_pad+2p, 2)
    pieces = [x_t[:, k:k + t_pad, :] for k in range(K)]        # K x (B, t_pad, 2)
    extra = ck_pad - 2 * K
    if extra:
        pieces.append(jnp.zeros((B, t_pad, extra), jnp.bfloat16))
    patches = jnp.concatenate(pieces, axis=2)                  # (B, t_pad, ck_pad)

    out = pl.pallas_call(
        _fused_matmul_kernel,
        out_shape=jax.ShapeDtypeStruct((B, t_pad, a_pad), jnp.float32),
        grid_spec=pltpu.PrefetchScalarGridSpec(
            num_scalar_prefetch=0,
            grid=(B, nt),
            in_specs=[
                pl.BlockSpec((None, tile_t, ck_pad), lambda b, t: (b, t, 0)),
                pl.BlockSpec((ck_pad, a_pad), lambda b, t: (0, 0)),
            ],
            out_specs=pl.BlockSpec((None, tile_t, a_pad), lambda b, t: (b, t, 0)),
        ),
        compiler_params=pltpu.CompilerParams(
            dimension_semantics=("parallel", "parallel")),
    )(patches, wf_fused)

    # Only materializes a copy when padding was actually added (skipped for
    # the common case T % 16 == 0 and attention_dim == 128).
    if t_pad != T or a_pad != A:
        out = out[:, :T, :A]
    return out


def location_layer_forward(attention_weights_cat, conv_weight, dense_weight_t):
    """Convenience wrapper that fuses the weights per call.  For inference,
    hoist fuse_location_weights() out of the loop and call *_apply directly."""
    K = conv_weight.shape[-1]
    A = dense_weight_t.shape[1]
    wf = fuse_location_weights(conv_weight, dense_weight_t)
    return location_layer_apply(attention_weights_cat, wf,
                                kernel_size=K, attention_dim=A)


def _xavier_uniform(key, shape, fan_in, fan_out, gain=1.0):
    limit = gain * jnp.sqrt(6.0 / (fan_in + fan_out))
    return jax.random.uniform(key, shape, jnp.float32, -limit, limit)


def _reference(attention_weights_cat, conv_weight, dense_weight_t):
    K = conv_weight.shape[-1]
    pad = (K - 1) // 2
    conv = lax.conv_general_dilated(
        attention_weights_cat, conv_weight,
        window_strides=(1,), padding=[(pad, pad)],
        dimension_numbers=("NCH", "OIH", "NCH"))
    return jnp.einsum("bft,fa->bta", conv, dense_weight_t)


if __name__ == "__main__":
    # Module hyper-parameters (Tacotron2-style, kept small).
    attention_n_filters = 32
    attention_kernel_size = 31
    attention_dim = 128

    B, T = 2, 64

    key = jax.random.PRNGKey(0)
    k_x, k_conv, k_dense = jax.random.split(key, 3)

    attention_weights_cat = jax.random.uniform(k_x, (B, 2, T), jnp.float32)

    # ConvNorm: Conv1d(2, F, K, bias=False), xavier_uniform (gain 'linear' = 1.0)
    conv_weight = _xavier_uniform(
        k_conv, (attention_n_filters, 2, attention_kernel_size),
        fan_in=2 * attention_kernel_size,
        fan_out=attention_n_filters * attention_kernel_size,
        gain=1.0)

    # LinearNorm: Linear(F, A, bias=False), xavier_uniform, gain('tanh') = 5/3.
    # Torch weight is (A, F); store transposed (F, A) for the fused weight build.
    dense_weight = _xavier_uniform(
        k_dense, (attention_dim, attention_n_filters),
        fan_in=attention_n_filters, fan_out=attention_dim, gain=5.0 / 3.0)
    dense_weight_t = dense_weight.T

    # Hoisted weight fusion (done once), then the hot-path apply.
    wf_fused = fuse_location_weights(conv_weight, dense_weight_t)
    out = location_layer_apply(attention_weights_cat, wf_fused,
                               kernel_size=attention_kernel_size,
                               attention_dim=attention_dim)
    out = jax.block_until_ready(out)

    ref = _reference(attention_weights_cat, conv_weight, dense_weight_t)
    assert out.shape == (B, T, attention_dim)
    # bf16 inputs -> loosened tolerance (f32 accumulate on the MXU).
    assert jnp.allclose(out, ref, atol=5e-2, rtol=5e-2), "mismatch vs reference"

    print("KERNEL_OK")
</pallas_src>

<mosaic_0001>
module attributes {stable_mosaic.version = 11 : i64} {
  func.func @_fused_matmul_kernel(%arg0: i32, %arg1: i32, %arg2: memref<1x64x64xbf16, #tpu.memory_space<vmem>>, %arg3: memref<64x128xbf16, #tpu.memory_space<vmem>>, %arg4: memref<1x64x128xf32, #tpu.memory_space<vmem>>) attributes {dimension_semantics = [#tpu.dimension_semantics<parallel>, #tpu.dimension_semantics<parallel>], iteration_bounds = array<i64: 2, 1>, scalar_prefetch = 0 : i64, scratch_operands = 0 : i64, tpu.core_type = #tpu.core_type<tc>, window_params = [{transform_indices = @transform_0, window_bounds = array<i64: 1, 64, 64>}, {pipeline_mode = #tpu.pipeline_mode<synchronous>, transform_indices = @transform_1, window_bounds = array<i64: 64, 128>}, {transform_indices = @transform_2, window_bounds = array<i64: 1, 64, 128>}]} {
    %c0 = arith.constant 0 : index
    %c0_0 = arith.constant 0 : index
    %c0_1 = arith.constant 0 : index
    %0 = vector.load %arg2[%c0, %c0_0, %c0_1] : memref<1x64x64xbf16, #tpu.memory_space<vmem>>, vector<1x64x64xbf16>
    %1 = vector.shape_cast %0 : vector<1x64x64xbf16> to vector<64x64xbf16>
    %c0_2 = arith.constant 0 : index
    %c0_3 = arith.constant 0 : index
    %2 = vector.load %arg3[%c0_2, %c0_3] : memref<64x128xbf16, #tpu.memory_space<vmem>>, vector<64x128xbf16>
    %cst = arith.constant dense<0.000000e+00> : vector<64x128xf32>
    %3 = tpu.matmul %1, %2, %cst {dimension_numbers = #tpu.dot_dimension_numbers<[1], [0], [0], [1], [0, 0, 1, 1], [], []>} : vector<64x64xbf16>, vector<64x128xbf16>, vector<64x128xf32> -> vector<64x128xf32>
    %c0_4 = arith.constant 0 : index
    %c0_5 = arith.constant 0 : index
    %c0_6 = arith.constant 0 : index
    %4 = vector.load %arg4[%c0_4, %c0_5, %c0_6] : memref<1x64x128xf32, #tpu.memory_space<vmem>>, vector<1x64x128xf32>
    %5 = vector.shape_cast %4 : vector<1x64x128xf32> to vector<64x128xf32>
    %6 = vector.shape_cast %3 : vector<64x128xf32> to vector<1x64x128xf32>
    tpu.vector_store %arg4[%c0_4, %c0_5, %c0_6], %6 {strides = array<i32>} : memref<1x64x128xf32, #tpu.memory_space<vmem>>, vector<1x64x128xf32>,
    return
  }
  func.func @transform_0(%arg0: i32, %arg1: i32) -> (i32, i32, i32) {
    %c0_i32 = arith.constant 0 : i32
    %c0_i32_0 = arith.constant 0 : i32
    return %arg0, %arg1, %c0_i32 : i32, i32, i32
  }
  func.func @transform_1(%arg0: i32, %arg1: i32) -> (i32, i32) {
    %c0_i32 = arith.constant 0 : i32
    %c0_i32_0 = arith.constant 0 : i32
    %c0_i32_1 = arith.constant 0 : i32
    return %c0_i32, %c0_i32_0 : i32, i32
  }
  func.func @transform_2(%arg0: i32, %arg1: i32) -> (i32, i32, i32) {
    %c0_i32 = arith.constant 0 : i32
    %c0_i32_0 = arith.constant 0 : i32
    return %arg0, %arg1, %c0_i32 : i32, i32, i32
  }
}

</mosaic_0001>

<bundles_post_ra>
// kernel: location_layer_apply.1
= control target key start
LH: loop header
LB: loop body
LE: loop exit
PB: predicated region body
PF: predicated region fallthrough
CT: control target
= control target key end

     0   :  { %7 = vsyncpa [#allocation3], 0  ;;  %s768_s0 = inlined_call_operand.vmem [shape: bf16[2,64,64], index: 0, kind: input, shape index: {}]   ;;  %s769_s1 = inlined_call_operand.vmem [shape: bf16[64,128], index: 1, kind: input, shape index: {}]   ;;  %s770_s2 = inlined_call_operand.hbm [shape: f32[2,64,128], index: 2, kind: output, shape index: {}]  }
   0x1   :  { %9 = vsyncpa [#allocation3 + $0x1], 0  ;;  %s637_s9 = smov 0   ;;  %s639_s10 = smov 0  }
   0x2   :  { %s641_s11 = smov 0   ;;  %s643_s12 = smov 0  }
   0x3   :  { %s645_s13 = smov 0   ;;  %s647_s14 = smov 0  }
   0x4 LB: > { %s415_s15 = sadd.s32 4294967295, %s617_s14   ;;  %s416_s16 = sadd.s32 4294967294, %s617_s14   ;;  %s617_s14 = sphi %s647_s14, %s15_s14   ;;  %s613_s13 = sphi %s645_s13, %s777_s13   ;;  %s609_s12 = sphi %s643_s12, %s776_s12   ;;  %s605_s11 = sphi %s641_s11, %s775_s11   ;;  %s601_s10 = sphi %s639_s10, %s774_s10   ;;  %s597_s9 = sphi %s637_s9, %s773_s9  }
   0x5   : > { %s27_s17 = sadd.s32 1, %s613_s13  ;;  %s85_s18 = sadd.s32 1, %s605_s11 }
   0x6   : > { %p29_p0 = scmp.ge.s32.totalorder %s27_s17, 2  ;;  %p95_p1 = scmp.ne.s32.totalorder %s605_s11, %s601_s10 }
   0x7   : > { %p96_p2 = scmp.eq.s32.totalorder %s415_s15, 1  ;;  %p101_p3 = scmp.ne.s32.totalorder %s601_s10, %s597_s9 }
   0x8   : > { %s779_s17 = smov (%p29_p0, %s27_s17), 0  ;;  %p102_p5 = scmp.eq.s32.totalorder %s416_s16, 1 }
   0x9   : > { %p677_p4 = por %p96_p2, %p95_p1  ;;  %s80_s20 = ssub.s32 %s613_s13, %s779_s17 }
   0xa   : > { %p419_p6 = scmp.ge.s32.totalorder %s617_s14, 1  ;;  %p83_p7 = scmp.eq.s32.totalorder %s80_s20, 0 }
   0xb   : > { %p684_p8 = por %p102_p5, %p101_p3  ;;  %p136_p9 = scmp.lt.s32.totalorder %s617_s14, 3 }
   0xc   : > { %s690_s22 = scalar_select %p83_p7, %s605_s11, %s85_s18  }
   0xd   : > { %p137_p10 = pnand %p419_p6, %p136_p9 }
   0xe   : > { %v531_v0 = vld [vmem:[%s769_s1] sm:$0xff] (!%p137_p10)   ;;  %p163_p11 = scmp.lt.s32.totalorder (!%p137_p10), %s609_s12, 1  ;;  %v532_v1 = vld [vmem:[%s769_s1 + $0x8] sm:$0xff] (!%p137_p10)   ;;  %v533_v2 = vld [vmem:[%s769_s1 + $0x10] sm:$0xff] (!%p137_p10)   ;;  %vm234_vm0 = vcmask (!%p137_p10), 523264   ;;  %s159_s8 = sand.u32 (!%p137_p10), 1, %s601_s10  }
   0xf   : > { %140 = sbr.rel (%p137_p10) target bundleno = 261 (0x105), region = 28  ;;  %450 = vmatprep.subr.bf16.mxu0 (!%p137_p10), %v531_v0  ;;  %466 = vmatprep.subr.bf16.mxu1 (!%p137_p10), %v531_v0  ;;  %v534_v5 = vld [vmem:[%s769_s1 + $0x18] sm:$0xff] (!%p137_p10)   ;;  %s420_s15 = sshll.u32 (!%p137_p10), %s159_s8, 6 }
  0x10   : > { %451 = vmatpush3.bf16.msra.mxu0 (!%p137_p10), %v531_v0  ;;  %470 = vmatpush3.bf16.msra.mxu1 (!%p137_p10), %v531_v0  ;;  %s161_s16 = scalar_lea.vmem (!%p137_p10), [#allocation2], %s420_s15  ;;  %s441_s20 = sshll.u32 (!%p137_p10), %s609_s12, 10 }
  0x11   : > { %452 = vmatprep.subr.bf16.mxu0 (!%p137_p10), %v532_v1  ;;  %467 = vmatprep.subr.bf16.mxu1 (!%p137_p10), %v532_v1  ;;  %s336_s18 = sshll.u32 (!%p137_p10), %s161_s16, 4  ;;  %s720_s25 = scalar_lea.hbm (!%p137_p10), %s770_s2, %s441_s20  ;;  %s715_s18 = int_to_ptr.vmem [resolvable:$true] %s336_s18 }
  0x12   : > { %s539_s26 = scalar_lea.vmem (!%p137_p10), %s715_s18, 1024 }
  0x13   : > { %p540_p12 = scmp.ne.s32.totalorder (!%p137_p10), %s715_s18, %s539_s26 }
  0x14   : > { %453 = vmatpush3.bf16.msra.mxu0 (!%p137_p10), %v532_v1  ;;  %471 = vmatpush3.bf16.msra.mxu1 (!%p137_p10), %v532_v1 }
  0x15   : > { %454 = vmatprep.subr.bf16.mxu0 (!%p137_p10), %v533_v2  ;;  %468 = vmatprep.subr.bf16.mxu1 (!%p137_p10), %v533_v2  ;;  %p541_p13 = pnand (!%p137_p10), %p540_p12, %p677_p4 }
  0x16   : > { %s164_s27 = scalar_select %p163_p11, %s609_s12, 1 }
  0x17   : > { %s722_s12 = scalar_lea.sflag [#allocation3], %s159_s8  ;;  %p542_p0 = pneg %p541_p13 }
  0x18   : > { %s440_s30 = sshll.u32 %s164_s27, 5  ;;  %455 = vmatpush3.bf16.msra.mxu0 %v533_v2  ;;  %472 = vmatpush3.bf16.msra.mxu1 %v533_v2  ;;  %s619_s27 = smov [#allocation2]  }
  0x19   : > { %s170_s5 = scalar_lea.vmem %s768_s0, %s440_s30  ;;  %456 = vmatprep.subr.bf16.mxu0 %v534_v5  ;;  %469 = vmatprep.subr.bf16.mxu1 %v534_v5  ;;  %s543_s28 = sshll.u32 %s619_s27, 4  ;;  %s544_s28 = int_to_ptr.vmem [resolvable:$false] %s543_s28 }
  0x1a   : > { %v535_v3 = vld [vmem:[%s170_s5] sm:$0xff]   ;;  %v536_v4 = vld [vmem:[%s170_s5 + $0x10] sm:$0xff]   ;;  %v537_v6 = vld [vmem:[%s170_s5 + $0x8] sm:$0xff]   ;;  %s545_s29 = scalar_lea.vmem %s544_s28, 2048  ;;  %p546_p1 = scmp.lt.s32.totalorder %s715_s18, %s544_s28 }
  0x1b   : > { %458 = vmatprep.mubr.msk.bf16.mxu0 %vm234_vm0, %v535_v3  ;;  %462 = vmatprep.mubr.msk.bf16.mxu1 %vm234_vm0, %v536_v4  ;;  %v538_v7 = vld [vmem:[%s170_s5 + $0x18] sm:$0xff]   ;;  %p547_p2 = scmp.lt.s32.totalorder %s545_s29, %s539_s26 }
  0x1c   : > { %457 = vmatpush3.bf16.msra.mxu0 %v534_v5  ;;  %473 = vmatpush3.bf16.msra.mxu1 %v534_v5 }
  0x1d   : > { %p548_p3 = por %p547_p2, %p546_p1 }
  0x1f   : > { %459 = vmatmul.mubr.msk.bf16.vlgmr.msra.gmra.mrb[0].mxu0 %vm234_vm0, %v537_v6  ;;  %463 = vmatmul.mubr.msk.bf16.vlgmr.msra.gmra.mrb[0].mxu1 %vm234_vm0, %v538_v7  ;;  %p549_p5 = pnand %p548_p3, %p542_p0 }
  0xf2   : > { %v460_v8 = vpop.f32.mrb[0].mxu0  ;;  %v464_v9 = vpop.f32.mrb[0].mxu1 }
  0xf3   : > { %314 = vst [vmem:[%s161_s16 + $0x10] sm:$0xff] %v460_v8  ;;  %318 = vst [vmem:[%s161_s16 + $0x30] sm:$0xff] %v464_v9  ;;  %v281_v10 = vpop.f32.mrb[1].mxu0  ;;  %v297_v11 = vpop.f32.mrb[1].mxu1 }
  0xf4   : > { %312 = vst [vmem:[%s161_s16] sm:$0xff] %v281_v10  ;;  %316 = vst [vmem:[%s161_s16 + $0x20] sm:$0xff] %v297_v11  ;;  %v461_v12 = vpop.f32.mrb[2].mxu0  ;;  %v465_v13 = vpop.f32.mrb[2].mxu1 }
  0xf5   : > { %315 = vst [vmem:[%s161_s16 + $0x18] sm:$0xff] %v461_v12  ;;  %319 = vst [vmem:[%s161_s16 + $0x38] sm:$0xff] %v465_v13  ;;  %v284_v14 = vpop.f32.mrb[3].mxu0  ;;  %v300_v15 = vpop.f32.mrb[3].mxu1 }
  0xf6   : > { %313 = vst [vmem:[%s161_s16 + $0x8] sm:$0xff] %v284_v14  ;;  %317 = vst [vmem:[%s161_s16 + $0x28] sm:$0xff] %v300_v15 }
  0xf7   : > { %552 = shalt.err (!%p549_p5)
}
  0xf8   : > { %s553_s30 = scalar_lea.hbm %s720_s25, 1024  ;;  %s557_s5 = scalar_lea.hbm %s770_s2, 2048 }
  0xf9   : > { %p554_p6 = scmp.ne.s32.totalorder %s720_s25, %s553_s30  ;;  %p558_p10 = scmp.lt.u32.totalorder %s720_s25, %s770_s2 }
  0xfa   : > { %p559_p11 = scmp.lt.u32.totalorder %s557_s5, %s553_s30  ;;  %p561_p13 = scmp.lt.u32.totalorder %s553_s30, %s720_s25 }
  0xfb   : > { %p555_p7 = pnand %p554_p6, %p677_p4 }
  0xfc   : > { %p560_p12 = por %p559_p11, %p558_p10 }
  0xfd   : > { %p556_p9 = pneg %p555_p7 }
  0xfe   : > { %p562_p0 = por %p561_p13, %p560_p12 }
 0x100   : > { %p563_p1 = pnand %p562_p0, %p556_p9 }
 0x102   : > { %566 = shalt.err (!%p563_p1)
}
 0x103   : > { %s620_s8 = smov 128   ;;  %s621_s15 = smov 8  }
 0x104   : > { %474 = dma.vmem_to_hbm [thread:$0]  (%p677_p4), %s715_s18, 1024, %s720_s25, %s722_s12, %s620_s8, %s620_s8, %s621_s15  }
 0x105 PF: > { %p480_p2 = scmp.ge.s32.totalorder %s617_s14, 2  ;;  %s351_s16 = sand.u32 1, %s597_s9  }
 0x106   : > { %s352_s20 = scalar_lea.sflag [#allocation3], %s351_s16 }
 0x107   : > { %p477_p3 = pnand %p480_p2, %p684_p8 }
 0x109   : > { %592 = dma.done.wait (!%p477_p3), %s352_s20, 1024  }
 0x10a   : > { %594 = vsyncadd (!%p477_p3), %s352_s20, 4294966272  ;;  %s15_s14 = sadd.s32 1, %s617_s14   ;;  %s773_s9 = smov %s601_s10 }
 0x10b   : > { %p12_p5 = scmp.ge.s32.totalorder %s15_s14, 4   ;;  %s774_s10 = smov %s605_s11 }
 0x10c   : > { %s775_s11 = smov %s690_s22  ;;  %s776_s12 = smov %s613_s13 }
 0x10d   : > { %s777_s13 = smov %s779_s17  ;;  %14 = sbr.rel (!%p12_p5) target bundleno = 4 (0x4), region = 63 }
 0x114   :  { %357 = vsyncpa [#allocation3], 1 }
 0x115   :  { %359 = vsyncpa [#allocation3 + $0x1], 1 }

</bundles_post_ra>
